<compile_context>
chip_gen: v7x
topology: tpu7x:2x2x1
jax: 0.10.0
libtpu: 0.0.40
codegen_flags: <defaults>
</compile_context>

<pallas_src>
import numpy as np
import jax
import jax.numpy as jnp
from jax import lax
from jax.experimental import pallas as pl
from jax.experimental.pallas import tpu as pltpu

LN_EPS = 1e-5  # PyTorch nn.LayerNorm default


def _round_up(n, m):
    return ((n + m - 1) // m) * m


def _make_actor_kernel(in_dims, fc1_dims, fc2_dims, f1p, f2p, nap, r1, r2):
    """f1p/f2p/nap: 128-padded widths; r1/r2: 16-aligned row starts of w2/w3."""
    inv_f1 = 1.0 / float(fc1_dims)   # real feature counts for LN stats
    inv_f2 = 1.0 / float(fc2_dims)

    def kernel(x_ref, w_ref, v_ref, o_ref):
        x = x_ref[...]  # (TB, in_dims) bf16, cast in the wrapper

        # ---- fc1 (bf16 operands, f32 accumulate) + bias (padded lanes = 0) ----
        h = jnp.dot(x, w_ref[0:in_dims, 0:f1p],
                    preferred_element_type=jnp.float32) + v_ref[0:1, 0:f1p]

        # ---- LayerNorm 1 + ReLU ----
        # Single-pass stats (E[x^2]-E[x]^2): slightly less accurate than the
        # two-pass form when |mean| >> std, but the bf16 matmul error dominates
        # at these scales. Padded lanes of h are exactly 0 and gamma/beta are 0
        # there, so they stay 0 and the divisor is the real feature count.
        s1 = jnp.sum(h, axis=-1, keepdims=True)
        s2 = jnp.sum(h * h, axis=-1, keepdims=True)
        mu = s1 * inv_f1
        var = jnp.maximum(s2 * inv_f1 - mu * mu, 0.0)
        h = (h - mu) * lax.rsqrt(var + LN_EPS)
        h = h * v_ref[1:2, 0:f1p] + v_ref[2:3, 0:f1p]
        h = jnp.maximum(h, 0.0)

        # ---- fc2 + LayerNorm 2 + ReLU ----
        h = jnp.dot(h.astype(jnp.bfloat16), w_ref[r1:r1 + f1p, 0:f2p],
                    preferred_element_type=jnp.float32) + v_ref[3:4, 0:f2p]
        s1 = jnp.sum(h, axis=-1, keepdims=True)
        s2 = jnp.sum(h * h, axis=-1, keepdims=True)
        mu = s1 * inv_f2
        var = jnp.maximum(s2 * inv_f2 - mu * mu, 0.0)
        h = (h - mu) * lax.rsqrt(var + LN_EPS)
        h = h * v_ref[4:5, 0:f2p] + v_ref[5:6, 0:f2p]
        h = jnp.maximum(h, 0.0)

        # ---- fc3 (no activation); lane-dense store (n_actions padded to nap) ----
        o_ref[...] = jnp.dot(h.astype(jnp.bfloat16), w_ref[r2:r2 + f2p, 0:nap],
                             preferred_element_type=jnp.float32) + v_ref[6:7, 0:nap]

    return kernel


def pack_params(params):
    """Pack the 10 tensors into (bf16 weight slab, f32 vector slab, dims).

    Layout: all layer widths padded to 128 lanes; each weight block's starting
    row aligned to the bf16 sublane tile (16 rows); padded lanes of
    bias/gamma/beta are zero so padded activation columns stay exactly 0.
    """
    (w1, b1, g1, be1, w2, b2, g2, be2, w3, b3) = params
    in_dims, fc1_dims = w1.shape
    fc2_dims = w2.shape[1]
    n_actions = w3.shape[1]

    f1p = _round_up(fc1_dims, 128)
    f2p = _round_up(fc2_dims, 128)
    nap = _round_up(n_actions, 128)
    width = max(f1p, f2p, nap)

    r1 = _round_up(in_dims, 16)   # start of w2 block (bf16 sublane-tile aligned)
    r2 = r1 + f1p                 # start of w3 block (f1p is a 128-multiple)
    rows = r2 + f2p

    W = jnp.zeros((rows, width), jnp.bfloat16)
    W = W.at[0:in_dims, 0:fc1_dims].set(w1.astype(jnp.bfloat16))
    W = W.at[r1:r1 + fc1_dims, 0:fc2_dims].set(w2.astype(jnp.bfloat16))
    W = W.at[r2:r2 + fc2_dims, 0:n_actions].set(w3.astype(jnp.bfloat16))

    V = jnp.zeros((8, width), jnp.float32)
    V = V.at[0, 0:fc1_dims].set(b1.reshape(-1))
    V = V.at[1, 0:fc1_dims].set(g1.reshape(-1))
    V = V.at[2, 0:fc1_dims].set(be1.reshape(-1))
    V = V.at[3, 0:fc2_dims].set(b2.reshape(-1))
    V = V.at[4, 0:fc2_dims].set(g2.reshape(-1))
    V = V.at[5, 0:fc2_dims].set(be2.reshape(-1))
    V = V.at[6, 0:n_actions].set(b3.reshape(-1))

    dims = (in_dims, fc1_dims, fc2_dims, n_actions, f1p, f2p, nap, r1, r2)
    return W, V, dims


def actor_forward(x, W, V, dims, *, tile_b=None):
    """Fused ActorNetwork forward.

    tile_b=None  -> gridless: whole (padded) batch + all params resident in
                    VMEM. Right choice for small inference batches.
    tile_b=int   -> 1-D parallel batch grid (tile_b must be a multiple of 16):
                    for large training batches; shards across v7x's two
                    TensorCores and bounds per-step VMEM on v5e/v7x.
    """
    in_dims, fc1_dims, fc2_dims, n_actions, f1p, f2p, nap, r1, r2 = dims
    B = x.shape[0]

    if tile_b is None:
        Bp = _round_up(max(B, 16), 16)          # 16 sublanes: bf16 vreg packing
    else:
        assert tile_b % 16 == 0
        Bp = _round_up(max(B, tile_b), tile_b)
    if Bp != B:
        x = jnp.pad(x, ((0, Bp - B), (0, 0)))
    x = x.astype(jnp.bfloat16)                  # halve x DMA, drop in-kernel pack

    kernel = _make_actor_kernel(in_dims, fc1_dims, fc2_dims, f1p, f2p, nap, r1, r2)
    out_shape = jax.ShapeDtypeStruct((Bp, nap), jnp.float32)

    if tile_b is None:
        vmem = pl.BlockSpec(memory_space=pltpu.MemorySpace.VMEM)
        out = pl.pallas_call(
            kernel,
            out_shape=out_shape,
            in_specs=[vmem, vmem, vmem],
            out_specs=vmem,
        )(x, W, V)
    else:
        grid = (Bp // tile_b,)
        out = pl.pallas_call(
            kernel,
            out_shape=out_shape,
            grid_spec=pltpu.PrefetchScalarGridSpec(
                num_scalar_prefetch=0,
                grid=grid,
                in_specs=[
                    pl.BlockSpec((tile_b, in_dims), lambda i: (i, 0)),
                    pl.BlockSpec(W.shape, lambda i: (0, 0)),   # weights resident
                    pl.BlockSpec(V.shape, lambda i: (0, 0)),   # vectors resident
                ],
                out_specs=pl.BlockSpec((tile_b, nap), lambda i: (i, 0)),
            ),
            compiler_params=pltpu.CompilerParams(
                dimension_semantics=("parallel",),     # megacore on v7x
                vmem_limit_bytes=32 * 1024 * 1024,     # safe on v5e/v6e/v7x
            ),
        )(x, W, V)
    return out[:B, :n_actions]


def init_params(key, input_dims, fc1_dims, fc2_dims, n_actions):
    """Deterministic init matching the PyTorch module's scheme.

    PyTorch: fc.weight shape (out, in); f = 1/sqrt(weight.size()[0]) = 1/sqrt(out),
    weight and bias ~ U(-f, f). LayerNorm: gamma=1, beta=0. Weights stored here
    transposed as (in, out) for the x @ W convention.
    """
    ks = jax.random.split(key, 6)
    f1 = 1.0 / np.sqrt(fc1_dims)
    f2 = 1.0 / np.sqrt(fc2_dims)
    f3 = 1.0 / np.sqrt(n_actions)

    w1 = jax.random.uniform(ks[0], (input_dims, fc1_dims), jnp.float32, -f1, f1)
    b1 = jax.random.uniform(ks[1], (1, fc1_dims), jnp.float32, -f1, f1)
    g1 = jnp.ones((1, fc1_dims), jnp.float32)
    be1 = jnp.zeros((1, fc1_dims), jnp.float32)

    w2 = jax.random.uniform(ks[2], (fc1_dims, fc2_dims), jnp.float32, -f2, f2)
    b2 = jax.random.uniform(ks[3], (1, fc2_dims), jnp.float32, -f2, f2)
    g2 = jnp.ones((1, fc2_dims), jnp.float32)
    be2 = jnp.zeros((1, fc2_dims), jnp.float32)

    w3 = jax.random.uniform(ks[4], (fc2_dims, n_actions), jnp.float32, -f3, f3)
    b3 = jax.random.uniform(ks[5], (1, n_actions), jnp.float32, -f3, f3)

    return (w1, b1, g1, be1, w2, b2, g2, be2, w3, b3)


def reference_forward(x, params, bf16_matmul=True):
    """Pure-JAX reference. bf16_matmul=True mirrors the kernel's MXU dtype."""
    (w1, b1, g1, be1, w2, b2, g2, be2, w3, b3) = params

    def ln(h, g, be):
        mu = jnp.mean(h, axis=-1, keepdims=True)
        var = jnp.mean((h - mu) ** 2, axis=-1, keepdims=True)
        return (h - mu) / jnp.sqrt(var + LN_EPS) * g + be

    def mm(a, w):
        if bf16_matmul:
            return jnp.dot(a.astype(jnp.bfloat16), w.astype(jnp.bfloat16),
                           preferred_element_type=jnp.float32)
        return jnp.dot(a, w)

    h = jax.nn.relu(ln(mm(x, w1) + b1, g1, be1))
    h = jax.nn.relu(ln(mm(h, w2) + b2, g2, be2))
    return mm(h, w3) + b3


if __name__ == "__main__":
    # Small shapes consistent with the module (flat observation vector).
    B, input_dims, fc1_dims, fc2_dims, n_actions = 4, 16, 64, 64, 8

    key = jax.random.PRNGKey(0)
    pkey, xkey, xkey2 = jax.random.split(key, 3)
    params = init_params(pkey, input_dims, fc1_dims, fc2_dims, n_actions)
    W, V, dims = pack_params(params)

    # --- Path 1: tiny inference batch, gridless (everything VMEM-resident) ---
    x = jax.random.normal(xkey, (B, input_dims), dtype=jnp.float32)
    out = jax.block_until_ready(actor_forward(x, W, V, dims))
    assert out.shape == (B, n_actions)

    # Tight check vs. a reference that mirrors the kernel's bf16-operand matmuls.
    ref_bf16 = reference_forward(x, params, bf16_matmul=True)
    np.testing.assert_allclose(np.asarray(out), np.asarray(ref_bf16),
                               rtol=2e-3, atol=2e-3)
    # Loose sanity check vs. the full-f32 PyTorch-equivalent math.
    ref_f32 = reference_forward(x, params, bf16_matmul=False)
    np.testing.assert_allclose(np.asarray(out), np.asarray(ref_f32),
                               rtol=5e-2, atol=5e-2)

    # --- Path 2: batch-grid configuration (large-batch / v7x megacore path),
    # exercised here with a small tile just to validate it end-to-end. ---
    B2 = 200
    x2 = jax.random.normal(xkey2, (B2, input_dims), dtype=jnp.float32)
    out2 = jax.block_until_ready(actor_forward(x2, W, V, dims, tile_b=128))
    assert out2.shape == (B2, n_actions)
    ref2 = reference_forward(x2, params, bf16_matmul=True)
    np.testing.assert_allclose(np.asarray(out2), np.asarray(ref2),
                               rtol=2e-3, atol=2e-3)

    # TODO(synk): optimizer (Adam), checkpoint I/O and torch.tensor/device
    # plumbing from the PyTorch module are host-side concerns, not kernel work.
    print("KERNEL_OK")
</pallas_src>

<mosaic_0001>
module attributes {stable_mosaic.version = 11 : i64} {
  func.func @kernel(%arg0: memref<16x16xbf16, #tpu.memory_space<vmem>>, %arg1: memref<272x128xbf16, #tpu.memory_space<vmem>>, %arg2: memref<8x128xf32, #tpu.memory_space<vmem>>, %arg3: memref<16x128xf32, #tpu.memory_space<vmem>>) attributes {dimension_semantics = [], scalar_prefetch = 0 : i64, scratch_operands = 0 : i64, tpu.core_type = #tpu.core_type<tc>} {
    %c0 = arith.constant 0 : index
    %c0_0 = arith.constant 0 : index
    %0 = vector.load %arg0[%c0, %c0_0] : memref<16x16xbf16, #tpu.memory_space<vmem>>, vector<16x16xbf16>
    %c0_1 = arith.constant 0 : index
    %c0_2 = arith.constant 0 : index
    %1 = vector.load %arg1[%c0_1, %c0_2] : memref<272x128xbf16, #tpu.memory_space<vmem>>, vector<16x128xbf16>
    %cst = arith.constant dense<0.000000e+00> : vector<16x128xf32>
    %2 = tpu.matmul %0, %1, %cst {dimension_numbers = #tpu.dot_dimension_numbers<[1], [0], [0], [1], [0, 0, 1, 1], [], []>} : vector<16x16xbf16>, vector<16x128xbf16>, vector<16x128xf32> -> vector<16x128xf32>
    %c0_3 = arith.constant 0 : index
    %c0_4 = arith.constant 0 : index
    %3 = vector.load %arg2[%c0_3, %c0_4] : memref<8x128xf32, #tpu.memory_space<vmem>>, vector<1x128xf32>
    %4 = vector.broadcast %3 : vector<1x128xf32> to vector<16x128xf32>
    %5 = arith.addf %2, %4 : vector<16x128xf32>
    %cst_5 = arith.constant dense<0.000000e+00> : vector<16xf32>
    %6 = vector.multi_reduction <add>, %5, %cst_5 [1] : vector<16x128xf32> to vector<16xf32>
    %7 = vector.shape_cast %6 : vector<16xf32> to vector<16x1xf32>
    %8 = arith.mulf %5, %5 : vector<16x128xf32>
    %cst_6 = arith.constant dense<0.000000e+00> : vector<16xf32>
    %9 = vector.multi_reduction <add>, %8, %cst_6 [1] : vector<16x128xf32> to vector<16xf32>
    %10 = vector.shape_cast %9 : vector<16xf32> to vector<16x1xf32>
    %cst_7 = arith.constant 1.562500e-02 : f32
    %11 = vector.broadcast %cst_7 : f32 to vector<16x1xf32>
    %12 = arith.mulf %7, %11 : vector<16x1xf32>
    %cst_8 = arith.constant 1.562500e-02 : f32
    %13 = vector.broadcast %cst_8 : f32 to vector<16x1xf32>
    %14 = arith.mulf %10, %13 : vector<16x1xf32>
    %15 = arith.mulf %12, %12 : vector<16x1xf32>
    %16 = arith.subf %14, %15 : vector<16x1xf32>
    %cst_9 = arith.constant 0.000000e+00 : f32
    %17 = vector.broadcast %cst_9 : f32 to vector<16x1xf32>
    %18 = arith.maximumf %16, %17 : vector<16x1xf32>
    %19 = vector.broadcast %12 : vector<16x1xf32> to vector<16x128xf32>
    %20 = arith.subf %5, %19 : vector<16x128xf32>
    %cst_10 = arith.constant 9.99999974E-6 : f32
    %21 = vector.broadcast %cst_10 : f32 to vector<16x1xf32>
    %22 = arith.addf %18, %21 : vector<16x1xf32>
    %23 = math.rsqrt %22 : vector<16x1xf32>
    %24 = vector.broadcast %23 : vector<16x1xf32> to vector<16x128xf32>
    %25 = arith.mulf %20, %24 : vector<16x128xf32>
    %c1 = arith.constant 1 : index
    %c0_11 = arith.constant 0 : index
    %26 = vector.load %arg2[%c1, %c0_11] : memref<8x128xf32, #tpu.memory_space<vmem>>, vector<1x128xf32>
    %27 = vector.broadcast %26 : vector<1x128xf32> to vector<16x128xf32>
    %28 = arith.mulf %25, %27 : vector<16x128xf32>
    %c2 = arith.constant 2 : index
    %c0_12 = arith.constant 0 : index
    %29 = vector.load %arg2[%c2, %c0_12] : memref<8x128xf32, #tpu.memory_space<vmem>>, vector<1x128xf32>
    %30 = vector.broadcast %29 : vector<1x128xf32> to vector<16x128xf32>
    %31 = arith.addf %28, %30 : vector<16x128xf32>
    %cst_13 = arith.constant 0.000000e+00 : f32
    %32 = vector.broadcast %cst_13 : f32 to vector<16x128xf32>
    %33 = arith.maximumf %31, %32 : vector<16x128xf32>
    %34 = arith.truncf %33 : vector<16x128xf32> to vector<16x128xbf16>
    %c16 = arith.constant 16 : index
    %c0_14 = arith.constant 0 : index
    %35 = vector.load %arg1[%c16, %c0_14] : memref<272x128xbf16, #tpu.memory_space<vmem>>, vector<128x128xbf16>
    %cst_15 = arith.constant dense<0.000000e+00> : vector<16x128xf32>
    %36 = tpu.matmul %34, %35, %cst_15 {dimension_numbers = #tpu.dot_dimension_numbers<[1], [0], [0], [1], [0, 0, 1, 1], [], []>} : vector<16x128xbf16>, vector<128x128xbf16>, vector<16x128xf32> -> vector<16x128xf32>
    %c3 = arith.constant 3 : index
    %c0_16 = arith.constant 0 : index
    %37 = vector.load %arg2[%c3, %c0_16] : memref<8x128xf32, #tpu.memory_space<vmem>>, vector<1x128xf32>
    %38 = vector.broadcast %37 : vector<1x128xf32> to vector<16x128xf32>
    %39 = arith.addf %36, %38 : vector<16x128xf32>
    %cst_17 = arith.constant dense<0.000000e+00> : vector<16xf32>
    %40 = vector.multi_reduction <add>, %39, %cst_17 [1] : vector<16x128xf32> to vector<16xf32>
    %41 = vector.shape_cast %40 : vector<16xf32> to vector<16x1xf32>
    %42 = arith.mulf %39, %39 : vector<16x128xf32>
    %cst_18 = arith.constant dense<0.000000e+00> : vector<16xf32>
    %43 = vector.multi_reduction <add>, %42, %cst_18 [1] : vector<16x128xf32> to vector<16xf32>
    %44 = vector.shape_cast %43 : vector<16xf32> to vector<16x1xf32>
    %cst_19 = arith.constant 1.562500e-02 : f32
    %45 = vector.broadcast %cst_19 : f32 to vector<16x1xf32>
    %46 = arith.mulf %41, %45 : vector<16x1xf32>
    %cst_20 = arith.constant 1.562500e-02 : f32
    %47 = vector.broadcast %cst_20 : f32 to vector<16x1xf32>
    %48 = arith.mulf %44, %47 : vector<16x1xf32>
    %49 = arith.mulf %46, %46 : vector<16x1xf32>
    %50 = arith.subf %48, %49 : vector<16x1xf32>
    %cst_21 = arith.constant 0.000000e+00 : f32
    %51 = vector.broadcast %cst_21 : f32 to vector<16x1xf32>
    %52 = arith.maximumf %50, %51 : vector<16x1xf32>
    %53 = vector.broadcast %46 : vector<16x1xf32> to vector<16x128xf32>
    %54 = arith.subf %39, %53 : vector<16x128xf32>
    %cst_22 = arith.constant 9.99999974E-6 : f32
    %55 = vector.broadcast %cst_22 : f32 to vector<16x1xf32>
    %56 = arith.addf %52, %55 : vector<16x1xf32>
    %57 = math.rsqrt %56 : vector<16x1xf32>
    %58 = vector.broadcast %57 : vector<16x1xf32> to vector<16x128xf32>
    %59 = arith.mulf %54, %58 : vector<16x128xf32>
    %c4 = arith.constant 4 : index
    %c0_23 = arith.constant 0 : index
    %60 = vector.load %arg2[%c4, %c0_23] : memref<8x128xf32, #tpu.memory_space<vmem>>, vector<1x128xf32>
    %61 = vector.broadcast %60 : vector<1x128xf32> to vector<16x128xf32>
    %62 = arith.mulf %59, %61 : vector<16x128xf32>
    %c5 = arith.constant 5 : index
    %c0_24 = arith.constant 0 : index
    %63 = vector.load %arg2[%c5, %c0_24] : memref<8x128xf32, #tpu.memory_space<vmem>>, vector<1x128xf32>
    %64 = vector.broadcast %63 : vector<1x128xf32> to vector<16x128xf32>
    %65 = arith.addf %62, %64 : vector<16x128xf32>
    %cst_25 = arith.constant 0.000000e+00 : f32
    %66 = vector.broadcast %cst_25 : f32 to vector<16x128xf32>
    %67 = arith.maximumf %65, %66 : vector<16x128xf32>
    %68 = arith.truncf %67 : vector<16x128xf32> to vector<16x128xbf16>
    %c144 = arith.constant 144 : index
    %c0_26 = arith.constant 0 : index
    %69 = vector.load %arg1[%c144, %c0_26] : memref<272x128xbf16, #tpu.memory_space<vmem>>, vector<128x128xbf16>
    %cst_27 = arith.constant dense<0.000000e+00> : vector<16x128xf32>
    %70 = tpu.matmul %68, %69, %cst_27 {dimension_numbers = #tpu.dot_dimension_numbers<[1], [0], [0], [1], [0, 0, 1, 1], [], []>} : vector<16x128xbf16>, vector<128x128xbf16>, vector<16x128xf32> -> vector<16x128xf32>
    %c6 = arith.constant 6 : index
    %c0_28 = arith.constant 0 : index
    %71 = vector.load %arg2[%c6, %c0_28] : memref<8x128xf32, #tpu.memory_space<vmem>>, vector<1x128xf32>
    %72 = vector.broadcast %71 : vector<1x128xf32> to vector<16x128xf32>
    %73 = arith.addf %70, %72 : vector<16x128xf32>
    %c0_29 = arith.constant 0 : index
    %c0_30 = arith.constant 0 : index
    %74 = vector.load %arg3[%c0_29, %c0_30] : memref<16x128xf32, #tpu.memory_space<vmem>>, vector<16x128xf32>
    tpu.vector_store %arg3[%c0_29, %c0_30], %73 {strides = array<i32>} : memref<16x128xf32, #tpu.memory_space<vmem>>, vector<16x128xf32>,
    return
  }
}

</mosaic_0001>

<bundles_post_ra>
// kernel: tpu_custom_call.1
= control target key start
LH: loop header
LB: loop body
LE: loop exit
PB: predicated region body
PF: predicated region fallthrough
CT: control target
= control target key end

     0   :  { %8 = vsyncpa [#allocation3], 0  ;;  %s777_s0 = inlined_call_operand.hbm [shape: bf16[16,16], index: 0, kind: input, shape index: {}]   ;;  %s778_s1 = inlined_call_operand.hbm [shape: bf16[272,128], index: 1, kind: input, shape index: {}]   ;;  %s779_s2 = inlined_call_operand.hbm [shape: f32[8,128], index: 2, kind: input, shape index: {}]   ;;  %s780_s3 = inlined_call_operand.hbm [shape: f32[16,128], index: 3, kind: output, shape index: {}]  }
   0x1   :  { %9 = vsyncpa [#allocation6], 0 }
   0x2   :  { %10 = vsyncpa [#allocation4], 0  ;;  %s672_s12 = smov [#allocation5]   ;;  %s673_s14 = smov [#allocation2]  }
   0x3   :  { %s28_s13 = sshll.u32 %s672_s12, 4  ;;  %s16_s15 = sshll.u32 %s673_s14, 4  ;;  %s29_s13 = int_to_ptr.vmem [resolvable:$true] %s28_s13  ;;  %s702_s15 = int_to_ptr.vmem [resolvable:$true] %s16_s15 }
   0x4   :  { %s578_s18 = scalar_lea.hbm %s778_s1, 2176 }
   0x5   :  { %p579_p0 = scmp.ne.s32.totalorder %s778_s1, %s578_s18  ;;  %p582_p1 = scmp.lt.u32.totalorder %s578_s18, %s778_s1 }
   0x7   :  { %p584_p2 = pnand %p582_p1, %p579_p0 }
   0x9   :  { %587 = shalt.err (!%p584_p2)
}
   0xa   :  { %s588_s23 = scalar_lea.vmem %s29_s13, 2176  ;;  %p593_p4 = scmp.lt.s32.totalorder %s29_s13, %s29_s13 }
   0xb   :  { %p589_p3 = scmp.ne.s32.totalorder %s29_s13, %s588_s23  ;;  %p594_p5 = scmp.lt.s32.totalorder %s588_s23, %s588_s23 }
   0xd   :  { %p595_p6 = por %p594_p5, %p593_p4 }
   0xf   :  { %p596_p7 = pnand %p595_p6, %p589_p3 }
  0x11   :  { %599 = shalt.err (!%p596_p7)
}
  0x12   :  { %s674_s24 = smov 64   ;;  %s675_s25 = smov 4  }
  0x13   :  { %34 = dma.hbm_to_vmem [thread:$0]  %s778_s1, 2176, %s29_s13, [#allocation6], %s674_s24, %s674_s24, %s675_s25  }
  0x14   :  { %s600_s30 = scalar_lea.hbm %s777_s0, 128 }
  0x15   :  { %p601_p8 = scmp.ne.s32.totalorder %s777_s0, %s600_s30  ;;  %p604_p9 = scmp.lt.u32.totalorder %s600_s30, %s777_s0 }
  0x17   :  { %p606_p10 = pnand %p604_p9, %p601_p8 }
  0x19   :  { %609 = shalt.err (!%p606_p10)
}
  0x1a   :  { %s610_s8 = scalar_lea.vmem %s702_s15, 128  ;;  %p615_p12 = scmp.lt.s32.totalorder %s702_s15, %s702_s15 }
  0x1b   :  { %p611_p11 = scmp.ne.s32.totalorder %s702_s15, %s610_s8  ;;  %p616_p13 = scmp.lt.s32.totalorder %s610_s8, %s610_s8 }
  0x1d   :  { %p617_p0 = por %p616_p13, %p615_p12 }
  0x1f   :  { %p618_p1 = pnand %p617_p0, %p611_p11 }
  0x21   :  { %621 = shalt.err (!%p618_p1)
}
  0x22   :  { %22 = dma.hbm_to_vmem [thread:$0]  %s777_s0, 128, %s702_s15, [#allocation3], %s674_s24, %s674_s24, %s675_s25  }
  0x23   :  { %s676_s10 = smov [#allocation7]   ;;  %s622_s14 = scalar_lea.hbm %s779_s2, 128 }
  0x24   :  { %s41_s11 = sshll.u32 %s676_s10, 4  ;;  %p623_p2 = scmp.ne.s32.totalorder %s779_s2, %s622_s14  ;;  %s42_s11 = int_to_ptr.vmem [resolvable:$true] %s41_s11 }
  0x25   :  { %p626_p3 = scmp.lt.u32.totalorder %s622_s14, %s779_s2 }
  0x27   :  { %p628_p4 = pnand %p626_p3, %p623_p2 }
  0x29   :  { %631 = shalt.err (!%p628_p4)
}
  0x2a   :  { %s632_s20 = scalar_lea.vmem %s42_s11, 128  ;;  %p637_p6 = scmp.lt.s32.totalorder %s42_s11, %s42_s11 }
  0x2b   :  { %p633_p5 = scmp.ne.s32.totalorder %s42_s11, %s632_s20  ;;  %p638_p7 = scmp.lt.s32.totalorder %s632_s20, %s632_s20 }
  0x2d   :  { %p639_p8 = por %p638_p7, %p637_p6 }
  0x2f   :  { %p640_p9 = pnand %p639_p8, %p633_p5 }
  0x31   :  { %643 = shalt.err (!%p640_p9)
}
  0x32   :  { %44 = dma.hbm_to_vmem [thread:$0]  %s779_s2, 128, %s42_s11, [#allocation6]  }
  0x33   :  { %666 = dma.done.wait [#allocation3], 128  }
  0x34   :  { %667 = vsyncadd [#allocation3], 4294967168 }
  0x35   :  { %668 = dma.done.wait [#allocation6], 2304  }
  0x36   :  { %669 = vsyncadd [#allocation6], 4294964992  ;;  %v677_v0 = vmov 0.0   ;;  %vm678_vm0 = vmmov 0   ;;  %v552_v1 = vld [vmem:[#allocation5] sm:$0xff]   ;;  %v553_v2 = vld [vmem:[#allocation2] sm:$0xff]  }
  0x37   :  { %496 = vmatprep.subr.bf16.mxu0 %v677_v0  ;;  %498 = vmatprep.mubr.msk.bf16.mxu0 %vm678_vm0, %v677_v0  ;;  %vm75_vm1 = vcmask 130048   ;;  %v450_v3 = vld [vmem:[#allocation7] ss:$0 sm:$0xff]  ;;  %v555_v13 = vld [vmem:[#allocation5 + $0x10] sm:$0xff]   ;;  %v556_v14 = vld [vmem:[#allocation5 + $0x18] sm:$0xff]   ;;  %s679_s2 = smov [#allocation8]  }
  0x38   :  { %502 = vmatprep.subr.bf16.mxu1 %v677_v0  ;;  %518 = vmatprep.mubr.msk.bf16.mxu1 %vm678_vm0, %v677_v0  ;;  %v554_v12 = vld [vmem:[#allocation5 + $0x8] sm:$0xff]   ;;  %v557_v15 = vld [vmem:[#allocation5 + $0x20] sm:$0xff]   ;;  %v559_v17 = vld [vmem:[#allocation5 + $0x30] sm:$0xff]   ;;  %s437_s21 = sshll.u32 %s679_s2, 4  ;;  %s438_s21 = int_to_ptr.vmem [resolvable:$true] %s437_s21 }
  0x39   :  { %497 = vmatpush3.bf16.msra.mxu0 %v552_v1  ;;  %503 = vmatpush3.bf16.msra.mxu1 %v554_v12  ;;  %v558_v16 = vld [vmem:[#allocation5 + $0x28] sm:$0xff]   ;;  %v560_v18 = vld [vmem:[#allocation5 + $0x38] sm:$0xff]   ;;  %v561_v19 = vld [vmem:[#allocation5 + $0x40] sm:$0xff]   ;;  %s644_s22 = scalar_lea.vmem %s438_s21, 256  ;;  %p649_p11 = scmp.lt.s32.totalorder %s438_s21, %s438_s21 }
  0x3a   :  { %522 = vmatprep.subr.bf16.mxu0 %v677_v0  ;;  %504 = vmatprep.subr.bf16.mxu1 %v677_v0  ;;  %v454_v38 = vld [vmem:[#allocation7 + $0x1] ss:$0 sm:$0xff]  ;;  %v455_v43 = vld [vmem:[#allocation7 + $0x2] ss:$0 sm:$0xff]  ;;  %v456_v51 = vld [vmem:[#allocation7 + $0x3] ss:$0 sm:$0xff]  ;;  %p645_p10 = scmp.ne.s32.totalorder %s438_s21, %s644_s22  ;;  %p650_p12 = scmp.lt.s32.totalorder %s644_s22, %s644_s22 }
  0x3b   :  { %v562_v60 = vld [vmem:[#allocation5 + $0x48] sm:$0xff]   ;;  %v563_v61 = vld [vmem:[#allocation5 + $0x50] sm:$0xff]   ;;  %v564_v62 = vld [vmem:[#allocation5 + $0x58] sm:$0xff]  }
  0x3c   :  { %499 = vmatmul.mubr.msk.bf16.vlgmr.msra.gmra.mrb[0].mxu0 %vm75_vm1, %v553_v2  ;;  %v565_v63 = vld [vmem:[#allocation5 + $0x60] sm:$0xff]   ;;  %v566_v1 = vld [vmem:[#allocation5 + $0x68] sm:$0xff]   ;;  %v567_v2 = vld [vmem:[#allocation5 + $0x70] sm:$0xff]   ;;  %p651_p13 = por %p650_p12, %p649_p11 }
  0x3d   :  { %538 = vmatprep.mubr.msk.bf16.mxu0 %vm678_vm0, %v677_v0  ;;  %505 = vmatpush3.bf16.msra.mxu1 %v555_v13 }
  0x3e   :  { %506 = vmatprep.subr.bf16.mxu1 %v677_v0  ;;  %523 = vmatpush3.bf16.msra.mxu0 %v562_v60  ;;  %p652_p0 = pnand %p651_p13, %p645_p10 }
  0x3f   :  { %524 = vmatprep.subr.bf16.mxu0 %v677_v0 }
  0x41   :  { %507 = vmatpush3.bf16.msra.mxu1 %v556_v14 }
  0x42   :  { %508 = vmatprep.subr.bf16.mxu1 %v677_v0  ;;  %525 = vmatpush3.bf16.msra.mxu0 %v563_v61 }
  0x43   :  { %526 = vmatprep.subr.bf16.mxu0 %v677_v0 }
  0x45   :  { %509 = vmatpush3.bf16.msra.mxu1 %v557_v15 }
  0x46   :  { %510 = vmatprep.subr.bf16.mxu1 %v677_v0  ;;  %527 = vmatpush3.bf16.msra.mxu0 %v564_v62 }
  0x47   :  { %528 = vmatprep.subr.bf16.mxu0 %v677_v0 }
  0x49   :  { %511 = vmatpush3.bf16.msra.mxu1 %v558_v16 }
  0x4a   :  { %512 = vmatprep.subr.bf16.mxu1 %v677_v0  ;;  %529 = vmatpush3.bf16.msra.mxu0 %v565_v63 }
  0x4b   :  { %530 = vmatprep.subr.bf16.mxu0 %v677_v0 }
  0x4d   :  { %513 = vmatpush3.bf16.msra.mxu1 %v559_v17 }
  0x4e   :  { %514 = vmatprep.subr.bf16.mxu1 %v677_v0  ;;  %531 = vmatpush3.bf16.msra.mxu0 %v566_v1 }
  0x4f   :  { %532 = vmatprep.subr.bf16.mxu0 %v677_v0 }
  0x51   :  { %515 = vmatpush3.bf16.msra.mxu1 %v560_v18 }
  0x52   :  { %516 = vmatprep.subr.bf16.mxu1 %v677_v0  ;;  %533 = vmatpush3.bf16.msra.mxu0 %v567_v2 }
  0x53   :  { %534 = vmatprep.subr.bf16.mxu0 %v677_v0 }
  0x55   :  { %517 = vmatpush3.bf16.msra.mxu1 %v561_v19 }
 0x10f   :  { %v113_v4 = vpop.f32.mrb[0].mxu0 }
 0x110   :  { %v114_v5 = vadd.f32 %v450_v3, %v113_v4  ;;  %v500_v6 = vpop.f32.mrb[1].mxu0  ;;  %v569_v4 = vld [vmem:[#allocation5 + $0x80] sm:$0xff]  }
 0x111   :  { %v116_v7 = vpop.f32.mrb[2].mxu0 }
 0x112   :  { %v117_v8 = vadd.f32 %v450_v3, %v116_v7  ;;  %120 = vadd.xlane.f32.xlu0 %v114_v5  ;;  %v501_v9 = vpop.f32.mrb[3].mxu0  ;;  %v124_v10 = vmul.f32 %v114_v5, %v114_v5  ;;  %v568_v3 = vld [vmem:[#allocation5 + $0x78] sm:$0xff]  }
 0x113   :  { %535 = vmatpush3.bf16.msra.mxu0 %v568_v3 }
 0x114   :  { %126 = vadd.xlane.f32.xlu1 %v124_v10  ;;  %v125_v11 = vmul.f32 %v117_v8, %v117_v8  ;;  %536 = vmatprep.subr.bf16.mxu0 %v677_v0 }
 0x116   :  { %122 = vadd.xlane.f32.xlu0 %v117_v8 }
 0x117   :  { %537 = vmatpush3.bf16.msra.mxu0 %v569_v4 }
 0x118   :  { %128 = vadd.xlane.f32.xlu1 %v125_v11 }
 0x19f   :  { %v121_v20 = vpop.xlane.xlu0 %120 }
 0x1a0   :  { %v130_v21 = vmul.f32 0.015625, %v121_v20 }
 0x1a1   :  { %v127_v22 = vpop.xlane.xlu1 %126 }
 0x1a2   :  { %v134_v23 = vmul.f32 %v130_v21, %v130_v21  ;;  %v132_v24 = vmul.f32 0.015625, %v127_v22  ;;  %v140_v36 = vsub.f32 %v114_v5, %v130_v21  ;;  %v465_v22 = vld [vmem:[#allocation7 + $0x4] ss:$0 sm:$0xff] }
 0x1a3   :  { %v123_v25 = vpop.xlane.xlu0 %122 }
 0x1a4   :  { %v136_v26 = vsub.f32 %v132_v24, %v134_v23  ;;  %v131_v27 = vmul.f32 0.015625, %v123_v25 }
 0x1a5   :  { %v129_v28 = vpop.xlane.xlu1 %128 }
 0x1a6   :  { %v138_v29 = vmax.f32 %v136_v26, 0.0  ;;  %v135_v30 = vmul.f32 %v131_v27, %v131_v27  ;;  %v133_v31 = vmul.f32 0.015625, %v129_v28  ;;  %v141_v40 = vsub.f32 %v117_v8, %v131_v27  ;;  %v466_v26 = vld [vmem:[#allocation7 + $0x5] ss:$0 sm:$0xff] }
 0x1a8   :  { %v142_v32 = vadd.f32 1e-05, %v138_v29  ;;  %v137_v33 = vsub.f32 %v133_v31, %v135_v30 }
 0x1aa   :  { %570 = vrsqrt.f32 %v142_v32  ;;  %v139_v34 = vmax.f32 %v137_v33, 0.0 }
 0x1ac   :  { %v143_v35 = vadd.f32 1e-05, %v139_v34 }
 0x1ae   :  { %572 = vrsqrt.f32 %v143_v35  ;;  %v467_v35 = vld [vmem:[#allocation7 + $0x6] ss:$0 sm:$0xff] }
 0x1b4   :  { %v571_v37 = vpop.eup %570 }
 0x1b5   :  { %v146_v39 = vmul.f32 %v571_v37, %v140_v36 }
 0x1b7   :  { %v153_v41 = vmul.f32 %v454_v38, %v146_v39 }
 0x1b8   :  { %v573_v42 = vpop.eup %572 }
 0x1b9   :  { %v147_v44 = vmul.f32 %v573_v42, %v141_v40  ;;  %v160_v46 = vadd.f32 %v455_v43, %v153_v41 }
 0x1bb   :  { %v154_v45 = vmul.f32 %v454_v38, %v147_v44  ;;  %v162_v48 = vmax.f32 %v160_v46, 0.0 }
 0x1bd   :  { %v161_v47 = vadd.f32 %v455_v43, %v154_v45 }
 0x1bf   :  { %v163_v49 = vmax.f32 %v161_v47, 0.0 }
 0x1c1   :  { %v164_v50 = vpack.c.bf16 %v163_v49, %v162_v48 }
 0x1c3   :  { %519 = vmatmul.mubr.bf16.vlgmr.msra.gmra.mrb[0].mxu1 %v164_v50 }
 0x296   :  { %v268_v52 = vpop.f32.mrb[0].mxu1 }
 0x297   :  { %v269_v53 = vadd.f32 %v456_v51, %v268_v52  ;;  %v520_v54 = vpop.f32.mrb[1].mxu1 }
 0x298   :  { %v271_v55 = vpop.f32.mrb[2].mxu1 }
 0x299   :  { %v272_v56 = vadd.f32 %v456_v51, %v271_v55  ;;  %275 = vadd.xlane.f32.xlu0 %v269_v53  ;;  %v521_v57 = vpop.f32.mrb[3].mxu1  ;;  %v279_v58 = vmul.f32 %v269_v53, %v269_v53 }
 0x29b   :  { %277 = vadd.xlane.f32.xlu1 %v272_v56  ;;  %v280_v59 = vmul.f32 %v272_v56, %v272_v56 }
 0x29d   :  { %281 = vadd.xlane.f32.xlu0 %v279_v58 }
 0x29f   :  { %283 = vadd.xlane.f32.xlu1 %v280_v59 }
 0x326   :  { %v276_v5 = vpop.xlane.xlu0 %275 }
 0x327   :  { %v285_v6 = vmul.f32 0.015625, %v276_v5 }
 0x328   :  { %v278_v7 = vpop.xlane.xlu1 %277 }
 0x329   :  { %v286_v8 = vmul.f32 0.015625, %v278_v7  ;;  %v289_v10 = vmul.f32 %v285_v6, %v285_v6  ;;  %v295_v0 = vsub.f32 %v269_v53, %v285_v6 }
 0x32a   :  { %v282_v9 = vpop.xlane.xlu0 %281 }
 0x32b   :  { %v287_v11 = vmul.f32 0.015625, %v282_v9  ;;  %v290_v13 = vmul.f32 %v286_v8, %v286_v8  ;;  %v296_v23 = vsub.f32 %v272_v56, %v286_v8 }
 0x32c   :  { %v284_v12 = vpop.xlane.xlu1 %283 }
 0x32d   :  { %v291_v14 = vsub.f32 %v287_v11, %v289_v10  ;;  %v288_v15 = vmul.f32 0.015625, %v284_v12 }
 0x32f   :  { %v293_v16 = vmax.f32 %v291_v14, 0.0  ;;  %v292_v17 = vsub.f32 %v288_v15, %v290_v13 }
 0x331   :  { %v297_v18 = vadd.f32 1e-05, %v293_v16  ;;  %v294_v19 = vmax.f32 %v292_v17, 0.0 }
 0x333   :  { %574 = vrsqrt.f32 %v297_v18  ;;  %v298_v20 = vadd.f32 1e-05, %v294_v19 }
 0x335   :  { %576 = vrsqrt.f32 %v298_v20 }
 0x33d   :  { %v575_v21 = vpop.eup %574 }
 0x33e   :  { %v301_v24 = vmul.f32 %v575_v21, %v295_v0 }
 0x33f   :  { %v577_v25 = vpop.eup %576 }
 0x340   :  { %v302_v27 = vmul.f32 %v577_v25, %v296_v23  ;;  %v308_v28 = vmul.f32 %v465_v22, %v301_v24 }
 0x342   :  { %v309_v29 = vmul.f32 %v465_v22, %v302_v27  ;;  %v315_v30 = vadd.f32 %v466_v26, %v308_v28 }
 0x344   :  { %v316_v31 = vadd.f32 %v466_v26, %v309_v29  ;;  %v317_v32 = vmax.f32 %v315_v30, 0.0 }
 0x346   :  { %v318_v33 = vmax.f32 %v316_v31, 0.0 }
 0x348   :  { %v319_v34 = vpack.c.bf16 %v318_v33, %v317_v32 }
 0x34a   :  { %539 = vmatmul.mubr.bf16.vlgmr.msra.gmra.mrb[4].mxu0 %v319_v34 }
 0x41d   :  { %v423_v36 = vpop.f32.mrb[4].mxu0 }
 0x41e   :  { %v424_v37 = vadd.f32 %v467_v35, %v423_v36  ;;  %v540_v38 = vpop.f32.mrb[5].mxu0 }
 0x41f   :  { %v426_v39 = vpop.f32.mrb[6].mxu0 }
 0x420   :  { %430 = vst [vmem:[#allocation8] sm:$0xff] %v424_v37  ;;  %v427_v40 = vadd.f32 %v467_v35, %v426_v39  ;;  %v541_v41 = vpop.f32.mrb[7].mxu0 }
 0x422   :  { %431 = vst [vmem:[#allocation8 + $0x8] sm:$0xff] %v427_v40 }
 0x423   :  { %655 = shalt.err (!%p652_p0)
}
 0x424   :  { %s656_s25 = scalar_lea.hbm %s780_s3, 256 }
 0x425   :  { %p657_p1 = scmp.ne.s32.totalorder %s780_s3, %s656_s25  ;;  %p660_p2 = scmp.lt.u32.totalorder %s656_s25, %s780_s3 }
 0x427   :  { %p662_p3 = pnand %p660_p2, %p657_p1 }
 0x429   :  { %665 = shalt.err (!%p662_p3)
}
 0x42a   :  { %s680_s30 = smov 128   ;;  %s681_s4 = smov 8  }
 0x42b   :  { %443 = dma.vmem_to_hbm [thread:$0]  %s438_s21, 256, %s780_s3, [#allocation4], %s680_s30, %s680_s30, %s681_s4  }
 0x42c   :  { %670 = dma.done.wait [#allocation4], 256  }
 0x42d   :  { %671 = vsyncadd [#allocation4], 4294967040 }
 0x42e   :  { %447 = vsyncpa [#allocation3], 1 }
 0x42f   :  { %448 = vsyncpa [#allocation6], 1 }
 0x430   :  { %449 = vsyncpa [#allocation4], 1 }

</bundles_post_ra>
